<compile_context>
chip_gen: v6e
topology: v6e:2x2x1
jax: 0.10.0
libtpu: 0.0.40
codegen_flags: <defaults>
</compile_context>

<pallas_src>
import numpy as np
import jax
import jax.numpy as jnp
from jax import lax
from jax.experimental import pallas as pl
from jax.experimental.pallas import tpu as pltpu


# ---------------------------------------------------------------------------
# Kernel
# ---------------------------------------------------------------------------
def noisy_linear_kernel(x_ref, mu_w_ref, sig_w_ref, mu_b_ref, sig_b_ref,
                        eps_p_ref, eps_q_ref, o_ref, acc_ref):
    k = pl.program_id(2)

    @pl.when(k == 0)
    def _init():
        # Bias is added exactly once: seed the f32 accumulator with it.
        b = mu_b_ref[...] + sig_b_ref[...] * eps_q_ref[...]          # (1, tn) f32
        acc_ref[...] = jnp.broadcast_to(b, acc_ref.shape)

    wdt = mu_w_ref.dtype
    xv = x_ref[...]                                                  # (tm, tk)
    x_w = xv.astype(wdt)                                             # MXU-native
    # Rank-1 noise: (x * eps_p) feeds the sigma_W dot; eps_q scales its output.
    x_scaled = (xv.astype(jnp.float32) * eps_p_ref[...]).astype(wdt)

    dn = (((1,), (1,)), ((), ()))                                    # contract last axes
    y_mu = lax.dot_general(x_w, mu_w_ref[...], dimension_numbers=dn,
                           preferred_element_type=jnp.float32)       # (tm, tn)
    y_sig = lax.dot_general(x_scaled, sig_w_ref[...], dimension_numbers=dn,
                            preferred_element_type=jnp.float32)      # (tm, tn)

    acc_ref[...] += y_mu + eps_q_ref[...] * y_sig

    @pl.when(k == pl.num_programs(2) - 1)
    def _store():
        o_ref[...] = acc_ref[...].astype(o_ref.dtype)


# ---------------------------------------------------------------------------
# Tiling / padding helpers
# ---------------------------------------------------------------------------
def _round_up(x, m):
    return ((x + m - 1) // m) * m


def _round_down(x, m):
    return (x // m) * m


def _choose_nk_tiles(In, Out, tn, tk):
    Np_min = _round_up(Out, 128)
    Kp_min = _round_up(In, 128)
    tn = min(tn, Np_min)
    tk = min(tk, Kp_min)
    # v7x megacore: with tiny batch the M grid axis has a single block, so make
    # sure there are >= 2 N blocks whenever Out allows it.
    if Np_min >= 256 and tn > Np_min // 2:
        tn = max(128, _round_down(Np_min // 2, 128))
    Np = _round_up(Out, tn)
    Kp = _round_up(In, tk)
    return tn, tk, Np, Kp


def _choose_m_tile(B, x_dtype, tm):
    # 16-sublane minimum tile for 16-bit activations, 8 for 32-bit.
    sub = 16 if jnp.dtype(x_dtype).itemsize == 2 else 8
    tm = max(sub, min(tm, _round_up(B, sub)))
    Mp = _round_up(B, tm)
    return tm, Mp


def _pad2(a, rows, cols):
    R, C = a.shape
    if (R, C) == (rows, cols):        # already padded at init -> no per-call op
        return a
    assert R <= rows and C <= cols
    return jnp.zeros((rows, cols), a.dtype).at[:R, :C].set(a)


def _row_strip(v, cols):
    v = v.astype(jnp.float32)
    return jnp.zeros((1, cols), jnp.float32).at[0, :v.shape[0]].set(v)


def prepare_noisy_linear_weights(mu_W, sigma_W, *, weight_dtype=jnp.bfloat16,
                                 tn=256, tk=512):
    """Pad + cast the weight matrices ONCE at parameter init.

    Pass the returned arrays to noisy_linear() (with the same tn/tk) and the
    forward path performs no per-call weight padding/casting at all.
    """
    Out, In = mu_W.shape
    if weight_dtype is None:
        weight_dtype = mu_W.dtype
    _, _, Np, Kp = _choose_nk_tiles(In, Out, tn, tk)
    return (_pad2(mu_W.astype(weight_dtype), Np, Kp),
            _pad2(sigma_W.astype(weight_dtype), Np, Kp))


# ---------------------------------------------------------------------------
# Wrapper
# ---------------------------------------------------------------------------
def noisy_linear(x, mu_W, sigma_W, mu_bias, sigma_bias, eps_p, eps_q, *,
                 weight_dtype=jnp.bfloat16, tm=256, tn=256, tk=512,
                 weight_buffers=2):
    """x: (B, in); mu_W/sigma_W: (out, in) or pre-padded via
    prepare_noisy_linear_weights; mu_bias/sigma_bias/eps_q: (out,);
    eps_p: (in,). Returns (B, out) in x.dtype (training-mode NoisyLinear)."""
    B, In = x.shape
    Out = mu_bias.shape[0]
    assert eps_p.shape[0] == In and eps_q.shape[0] == Out
    assert sigma_W.shape == mu_W.shape

    if weight_dtype is None:
        weight_dtype = mu_W.dtype

    tn, tk, Np, Kp = _choose_nk_tiles(In, Out, tn, tk)
    tm, Mp = _choose_m_tile(B, x.dtype, tm)

    # Accept weights pre-padded at init (128-aligned); adopt their padding.
    Wn, Wk = mu_W.shape
    assert Wn >= Out and Wk >= In
    if (Wn, Wk) != (Out, In):
        assert Wn % 128 == 0 and Wk % 128 == 0, "pre-padded weights must be 128-aligned"
    Np, Kp = max(Np, Wn), max(Kp, Wk)
    if Np % tn:
        tn = 128
    if Kp % tk:
        tk = 128

    f32 = jnp.float32
    # Weight pad/cast: no-ops when prepare_noisy_linear_weights() was used.
    mu_Wp = _pad2(mu_W.astype(weight_dtype), Np, Kp)
    sig_Wp = _pad2(sigma_W.astype(weight_dtype), Np, Kp)
    # Tiny per-call strips (KB-scale).
    xp = _pad2(x, Mp, Kp)
    mu_b = _row_strip(mu_bias, Np)
    sig_b = _row_strip(sigma_bias, Np)
    eps_p_row = _row_strip(eps_p, Kp)
    eps_q_row = _row_strip(eps_q, Np)

    grid = (Mp // tm, Np // tn, Kp // tk)

    xbytes = jnp.dtype(x.dtype).itemsize
    wbytes = jnp.dtype(weight_dtype).itemsize
    nbuf = max(2, weight_buffers)
    resident = (2 * tm * tk * xbytes              # x tiles (double-buffered)
                + nbuf * 2 * tn * tk * wbytes     # mu_W + sigma_W tiles
                + 2 * tm * tn * xbytes            # output tiles
                + tm * tn * 4                     # f32 accumulator scratch
                + 4 * (3 * tn + tk) * 4)          # bias / eps strips
    # >= 32 MiB (above v5e's 16 MiB scoped default), <= 48 MiB (headroom
    # under v7x's 64 MiB physical VMEM).
    vmem_limit = int(min(max(2 * resident, 32 * 2**20), 48 * 2**20))

    cost = pl.CostEstimate(
        flops=4 * B * Out * In,                   # two dots (rank-1 rewrite)
        transcendentals=0,
        bytes_accessed=int(2 * Out * In * wbytes + B * In * xbytes
                           + B * Out * xbytes))

    def _wspec():
        if weight_buffers > 2:
            return pl.BlockSpec((tn, tk), lambda i, j, k: (j, k),
                                pipeline_mode=pl.Buffered(weight_buffers))
        return pl.BlockSpec((tn, tk), lambda i, j, k: (j, k))

    out_p = pl.pallas_call(
        noisy_linear_kernel,
        out_shape=jax.ShapeDtypeStruct((Mp, Np), x.dtype),
        grid_spec=pltpu.PrefetchScalarGridSpec(
            num_scalar_prefetch=0,
            grid=grid,
            in_specs=[
                pl.BlockSpec((tm, tk), lambda i, j, k: (i, k)),   # x
                _wspec(),                                         # mu_W
                _wspec(),                                         # sigma_W
                pl.BlockSpec((1, tn), lambda i, j, k: (0, j)),    # mu_bias
                pl.BlockSpec((1, tn), lambda i, j, k: (0, j)),    # sigma_bias
                pl.BlockSpec((1, tk), lambda i, j, k: (0, k)),    # eps_p (row)
                pl.BlockSpec((1, tn), lambda i, j, k: (0, j)),    # eps_q (row)
            ],
            out_specs=pl.BlockSpec((tm, tn), lambda i, j, k: (i, j)),
            scratch_shapes=[pltpu.VMEM((tm, tn), jnp.float32)]),
        compiler_params=pltpu.CompilerParams(
            dimension_semantics=("parallel", "parallel", "arbitrary"),
            vmem_limit_bytes=vmem_limit),
        cost_estimate=cost,
    )(xp, mu_Wp, sig_Wp, mu_b, sig_b, eps_p_row, eps_q_row)

    return out_p[:B, :Out]


# ---------------------------------------------------------------------------
# Parameter construction / reference (matches the PyTorch module)
# ---------------------------------------------------------------------------
def factorized_noise(key, n):
    """PyTorch NoisyLinear.f: sign(x) * sqrt(|x|) of standard normal samples."""
    x = jax.random.normal(key, (n,), dtype=jnp.float32)
    return jnp.sign(x) * jnp.sqrt(jnp.abs(x))


def _make_params(key, in_features, out_features, noisy_std=0.5):
    k_muw, k_mub, k_ep, k_eq = jax.random.split(key, 4)
    bound = 1.0 / np.sqrt(in_features)
    mu_W = jax.random.uniform(k_muw, (out_features, in_features),
                              minval=-bound, maxval=bound, dtype=jnp.float32)
    mu_bias = jax.random.uniform(k_mub, (out_features,),
                                 minval=-bound, maxval=bound, dtype=jnp.float32)
    sigma_val = noisy_std / np.sqrt(in_features)
    sigma_W = jnp.full((out_features, in_features), sigma_val, dtype=jnp.float32)
    sigma_bias = jnp.full((out_features,), sigma_val, dtype=jnp.float32)
    eps_p = factorized_noise(k_ep, in_features)   # sample()
    eps_q = factorized_noise(k_eq, out_features)
    return mu_W, sigma_W, mu_bias, sigma_bias, eps_p, eps_q


def _reference(x, mu_W, sigma_W, mu_bias, sigma_bias, eps_p, eps_q):
    weight = mu_W + sigma_W * jnp.outer(eps_q, eps_p)
    bias = mu_bias + sigma_bias * eps_q
    return x @ weight.T + bias


# TODO(synk): eval-mode branch (weight = mu_W, bias = mu_bias) is the same
# kernel with eps_p/eps_q fed as zeros; only the training branch is exercised.

if __name__ == "__main__":
    key = jax.random.PRNGKey(0)
    k1, k2, kx1, kx2 = jax.random.split(key, 4)

    # --- Test 1: tiny RL-style layer (B=8, in=32, out=16), single tile. -----
    B, In, Out = 8, 32, 16
    params = _make_params(k1, In, Out)
    x = jax.random.normal(kx1, (B, In), dtype=jnp.float32)
    y_ref = _reference(x, *params)

    # Default: bf16 weight streaming (documented accuracy trade-off).
    y_bf16 = jax.block_until_ready(noisy_linear(x, *params))
    np.testing.assert_allclose(np.asarray(y_bf16), np.asarray(y_ref),
                               rtol=5e-2, atol=5e-2)

    # Exact f32 path, strict check.
    y_f32 = jax.block_until_ready(
        noisy_linear(x, *params, weight_dtype=jnp.float32))
    np.testing.assert_allclose(np.asarray(y_f32), np.asarray(y_ref),
                               rtol=1e-5, atol=1e-5)

    # --- Test 2: multi-tile grid (M/N/K blocks, K reduction, bias-once). ----
    B2, In2, Out2 = 16, 256, 256
    params2 = _make_params(k2, In2, Out2)
    x2 = jax.random.normal(kx2, (B2, In2), dtype=jnp.float32)
    y2_ref = _reference(x2, *params2)

    # f32 weights, strict check, grid = (2, 2, 2).
    y2_f32 = jax.block_until_ready(
        noisy_linear(x2, *params2, weight_dtype=jnp.float32,
                     tm=8, tn=128, tk=128))
    np.testing.assert_allclose(np.asarray(y2_f32), np.asarray(y2_ref),
                               rtol=1e-4, atol=1e-4)

    # Default call: bf16 streaming, >= 2 N blocks (v7x megacore), loose check.
    y2_bf16 = jax.block_until_ready(noisy_linear(x2, *params2))
    np.testing.assert_allclose(np.asarray(y2_bf16), np.asarray(y2_ref),
                               rtol=5e-2, atol=5e-2)

    # Pad/cast-once-at-init pattern: wrapper performs no per-call weight work.
    mu_Wp, sig_Wp = prepare_noisy_linear_weights(params2[0], params2[1])
    y2_prep = jax.block_until_ready(
        noisy_linear(x2, mu_Wp, sig_Wp, *params2[2:]))
    np.testing.assert_allclose(np.asarray(y2_prep), np.asarray(y2_bf16),
                               rtol=1e-6, atol=1e-6)

    print("KERNEL_OK")
</pallas_src>

<mosaic_0001>
module attributes {stable_mosaic.version = 11 : i64} {
  func.func @noisy_linear_kernel(%arg0: i32, %arg1: i32, %arg2: i32, %arg3: memref<8x128xf32, #tpu.memory_space<vmem>>, %arg4: memref<128x128xbf16, #tpu.memory_space<vmem>>, %arg5: memref<128x128xbf16, #tpu.memory_space<vmem>>, %arg6: memref<1x128xf32, #tpu.memory_space<vmem>>, %arg7: memref<1x128xf32, #tpu.memory_space<vmem>>, %arg8: memref<1x128xf32, #tpu.memory_space<vmem>>, %arg9: memref<1x128xf32, #tpu.memory_space<vmem>>, %arg10: memref<8x128xf32, #tpu.memory_space<vmem>>, %arg11: memref<8x128xf32, #tpu.memory_space<vmem>>) attributes {dimension_semantics = [#tpu.dimension_semantics<parallel>, #tpu.dimension_semantics<parallel>, #tpu.dimension_semantics<arbitrary>], iteration_bounds = array<i64: 1, 1, 1>, scalar_prefetch = 0 : i64, scratch_operands = 1 : i64, tpu.core_type = #tpu.core_type<tc>, window_params = [{transform_indices = @transform_0, window_bounds = array<i64: 8, 128>}, {transform_indices = @transform_1, window_bounds = array<i64: 128, 128>}, {transform_indices = @transform_2, window_bounds = array<i64: 128, 128>}, {transform_indices = @transform_3, window_bounds = array<i64: 1, 128>}, {transform_indices = @transform_4, window_bounds = array<i64: 1, 128>}, {transform_indices = @transform_5, window_bounds = array<i64: 1, 128>}, {transform_indices = @transform_6, window_bounds = array<i64: 1, 128>}, {transform_indices = @transform_7, window_bounds = array<i64: 8, 128>}]} {
    %c0_i32 = arith.constant 0 : i32
    %0 = arith.cmpi eq, %arg2, %c0_i32 : i32
    %1 = arith.extui %0 : i1 to i32
    %c0_i32_0 = arith.constant 0 : i32
    %2 = arith.cmpi ne, %1, %c0_i32_0 : i32
    scf.if %2 {
      %c0_17 = arith.constant 0 : index
      %c0_18 = arith.constant 0 : index
      %23 = vector.load %arg6[%c0_17, %c0_18] : memref<1x128xf32, #tpu.memory_space<vmem>>, vector<1x128xf32>
      %c0_19 = arith.constant 0 : index
      %c0_20 = arith.constant 0 : index
      %24 = vector.load %arg7[%c0_19, %c0_20] : memref<1x128xf32, #tpu.memory_space<vmem>>, vector<1x128xf32>
      %c0_21 = arith.constant 0 : index
      %c0_22 = arith.constant 0 : index
      %25 = vector.load %arg9[%c0_21, %c0_22] : memref<1x128xf32, #tpu.memory_space<vmem>>, vector<1x128xf32>
      %26 = arith.mulf %24, %25 : vector<1x128xf32>
      %27 = arith.addf %23, %26 : vector<1x128xf32>
      %28 = vector.shape_cast %27 : vector<1x128xf32> to vector<1x128xf32>
      %29 = vector.broadcast %28 : vector<1x128xf32> to vector<8x128xf32>
      %c0_23 = arith.constant 0 : index
      %c0_24 = arith.constant 0 : index
      %30 = vector.load %arg11[%c0_23, %c0_24] : memref<8x128xf32, #tpu.memory_space<vmem>>, vector<8x128xf32>
      tpu.vector_store %arg11[%c0_23, %c0_24], %29 {strides = array<i32>} : memref<8x128xf32, #tpu.memory_space<vmem>>, vector<8x128xf32>,
    } else {
    }
    %c0 = arith.constant 0 : index
    %c0_1 = arith.constant 0 : index
    %3 = vector.load %arg3[%c0, %c0_1] : memref<8x128xf32, #tpu.memory_space<vmem>>, vector<8x128xf32>
    %4 = arith.truncf %3 : vector<8x128xf32> to vector<8x128xbf16>
    %c0_2 = arith.constant 0 : index
    %c0_3 = arith.constant 0 : index
    %5 = vector.load %arg8[%c0_2, %c0_3] : memref<1x128xf32, #tpu.memory_space<vmem>>, vector<1x128xf32>
    %6 = vector.broadcast %5 : vector<1x128xf32> to vector<8x128xf32>
    %7 = arith.mulf %3, %6 : vector<8x128xf32>
    %8 = arith.truncf %7 : vector<8x128xf32> to vector<8x128xbf16>
    %c0_4 = arith.constant 0 : index
    %c0_5 = arith.constant 0 : index
    %9 = vector.load %arg4[%c0_4, %c0_5] : memref<128x128xbf16, #tpu.memory_space<vmem>>, vector<128x128xbf16>
    %cst = arith.constant dense<0.000000e+00> : vector<8x128xf32>
    %10 = tpu.matmul %4, %9, %cst {dimension_numbers = #tpu.dot_dimension_numbers<[1], [1], [0], [0], [0, 0, 1, 0], [], []>} : vector<8x128xbf16>, vector<128x128xbf16>, vector<8x128xf32> -> vector<8x128xf32>
    %c0_6 = arith.constant 0 : index
    %c0_7 = arith.constant 0 : index
    %11 = vector.load %arg5[%c0_6, %c0_7] : memref<128x128xbf16, #tpu.memory_space<vmem>>, vector<128x128xbf16>
    %cst_8 = arith.constant dense<0.000000e+00> : vector<8x128xf32>
    %12 = tpu.matmul %8, %11, %cst_8 {dimension_numbers = #tpu.dot_dimension_numbers<[1], [1], [0], [0], [0, 0, 1, 0], [], []>} : vector<8x128xbf16>, vector<128x128xbf16>, vector<8x128xf32> -> vector<8x128xf32>
    %c0_9 = arith.constant 0 : index
    %c0_10 = arith.constant 0 : index
    %13 = vector.load %arg11[%c0_9, %c0_10] : memref<8x128xf32, #tpu.memory_space<vmem>>, vector<8x128xf32>
    %c0_11 = arith.constant 0 : index
    %c0_12 = arith.constant 0 : index
    %14 = vector.load %arg9[%c0_11, %c0_12] : memref<1x128xf32, #tpu.memory_space<vmem>>, vector<1x128xf32>
    %15 = vector.broadcast %14 : vector<1x128xf32> to vector<8x128xf32>
    %16 = arith.mulf %15, %12 : vector<8x128xf32>
    %17 = arith.addf %10, %16 : vector<8x128xf32>
    %18 = arith.addf %13, %17 : vector<8x128xf32>
    %c0_13 = arith.constant 0 : index
    %c0_14 = arith.constant 0 : index
    %19 = vector.load %arg11[%c0_13, %c0_14] : memref<8x128xf32, #tpu.memory_space<vmem>>, vector<8x128xf32>
    tpu.vector_store %arg11[%c0_13, %c0_14], %18 {strides = array<i32>} : memref<8x128xf32, #tpu.memory_space<vmem>>, vector<8x128xf32>,
    %c0_i32_15 = arith.constant 0 : i32
    %20 = arith.cmpi eq, %arg2, %c0_i32_15 : i32
    %21 = arith.extui %20 : i1 to i32
    %c0_i32_16 = arith.constant 0 : i32
    %22 = arith.cmpi ne, %21, %c0_i32_16 : i32
    scf.if %22 {
      %c0_17 = arith.constant 0 : index
      %c0_18 = arith.constant 0 : index
      %23 = vector.load %arg11[%c0_17, %c0_18] : memref<8x128xf32, #tpu.memory_space<vmem>>, vector<8x128xf32>
      %c0_19 = arith.constant 0 : index
      %c0_20 = arith.constant 0 : index
      %24 = vector.load %arg10[%c0_19, %c0_20] : memref<8x128xf32, #tpu.memory_space<vmem>>, vector<8x128xf32>
      tpu.vector_store %arg10[%c0_19, %c0_20], %23 {strides = array<i32>} : memref<8x128xf32, #tpu.memory_space<vmem>>, vector<8x128xf32>,
    } else {
    }
    return
  }
  func.func @transform_0(%arg0: i32, %arg1: i32, %arg2: i32) -> (i32, i32) {
    %c0_i32 = arith.constant 0 : i32
    return %arg0, %arg2 : i32, i32
  }
  func.func @transform_1(%arg0: i32, %arg1: i32, %arg2: i32) -> (i32, i32) {
    %c0_i32 = arith.constant 0 : i32
    return %arg1, %arg2 : i32, i32
  }
  func.func @transform_2(%arg0: i32, %arg1: i32, %arg2: i32) -> (i32, i32) {
    %c0_i32 = arith.constant 0 : i32
    return %arg1, %arg2 : i32, i32
  }
  func.func @transform_3(%arg0: i32, %arg1: i32, %arg2: i32) -> (i32, i32) {
    %c0_i32 = arith.constant 0 : i32
    %c0_i32_0 = arith.constant 0 : i32
    return %c0_i32, %arg1 : i32, i32
  }
  func.func @transform_4(%arg0: i32, %arg1: i32, %arg2: i32) -> (i32, i32) {
    %c0_i32 = arith.constant 0 : i32
    %c0_i32_0 = arith.constant 0 : i32
    return %c0_i32, %arg1 : i32, i32
  }
  func.func @transform_5(%arg0: i32, %arg1: i32, %arg2: i32) -> (i32, i32) {
    %c0_i32 = arith.constant 0 : i32
    %c0_i32_0 = arith.constant 0 : i32
    return %c0_i32, %arg2 : i32, i32
  }
  func.func @transform_6(%arg0: i32, %arg1: i32, %arg2: i32) -> (i32, i32) {
    %c0_i32 = arith.constant 0 : i32
    %c0_i32_0 = arith.constant 0 : i32
    return %c0_i32, %arg1 : i32, i32
  }
  func.func @transform_7(%arg0: i32, %arg1: i32, %arg2: i32) -> (i32, i32) {
    %c0_i32 = arith.constant 0 : i32
    return %arg0, %arg1 : i32, i32
  }
}

</mosaic_0001>

<bundles_post_ra>
// kernel: tpu_custom_call.1
= control target key start
LH: loop header
LB: loop body
LE: loop exit
PB: predicated region body
PF: predicated region fallthrough
CT: control target
= control target key end

     0   :  { %12 = vsyncpa [#allocation4], 0  ;;  %s595_s0 = inlined_call_operand.hbm [shape: f32[8,128], index: 0, kind: input, shape index: {}]   ;;  %s596_s1 = inlined_call_operand.hbm [shape: bf16[128,128], index: 1, kind: input, shape index: {}]   ;;  %s597_s2 = inlined_call_operand.hbm [shape: bf16[128,128], index: 2, kind: input, shape index: {}]   ;;  %s598_s3 = inlined_call_operand.vmem [shape: f32[1,128], index: 3, kind: input, shape index: {}]   ;;  %s599_s4 = inlined_call_operand.vmem [shape: f32[1,128], index: 4, kind: input, shape index: {}]   ;;  %s600_s5 = inlined_call_operand.vmem [shape: f32[1,128], index: 5, kind: input, shape index: {}]   ;;  %s601_s6 = inlined_call_operand.vmem [shape: f32[1,128], index: 6, kind: input, shape index: {}]   ;;  %s602_s7 = inlined_call_operand.hbm [shape: f32[8,128], index: 7, kind: output, shape index: {}]  }
   0x1   :  { %13 = vsyncpa [#allocation7], 0 }
   0x2   :  { %14 = vsyncpa [#allocation5], 0  ;;  %s520_s24 = smov [#allocation6]  }
   0x3   :  { %s30_s25 = sshll.u32 %s520_s24, 4  ;;  %s31_s25 = int_to_ptr.vmem [resolvable:$true] %s30_s25 }
   0x4   :  { %s442_s26 = scalar_lea.vmem %s31_s25, 1024  ;;  %p447_p1 = scmp.lt.s32.totalorder %s31_s25, %s31_s25 }
   0x5   :  { %p443_p0 = scmp.ne.s32.totalorder %s31_s25, %s442_s26  ;;  %p448_p2 = scmp.lt.s32.totalorder %s442_s26, %s442_s26 }
   0x7   :  { %p449_p3 = por %p448_p2, %p447_p1 }
   0x9   :  { %p450_p4 = pnand %p449_p3, %p443_p0 }
   0xb   :  { %453 = shalt.err (!%p450_p4)
}
   0xc   :  { %s521_s27 = smov 64   ;;  %s522_s28 = smov 4  }
   0xd   :  { %36 = dma.hbm_to_vmem [thread:$0]  %s596_s1, 1024, %s31_s25, [#allocation7], %s521_s27, %s521_s27, %s522_s28  }
   0xe   :  { %s523_s8 = smov [#allocation3]   ;;  %s524_s10 = smov [#allocation8]  }
   0xf   :  { %s21_s9 = sshll.u32 %s523_s8, 4  ;;  %s42_s11 = sshll.u32 %s524_s10, 4  ;;  %s22_s9 = int_to_ptr.vmem [resolvable:$true] %s21_s9  ;;  %s43_s11 = int_to_ptr.vmem [resolvable:$true] %s42_s11 }
  0x10   :  { %s462_s12 = scalar_lea.vmem %s22_s9, 128  ;;  %p467_p6 = scmp.lt.s32.totalorder %s22_s9, %s22_s9 }
  0x11   :  { %p463_p5 = scmp.ne.s32.totalorder %s22_s9, %s462_s12  ;;  %p468_p7 = scmp.lt.s32.totalorder %s462_s12, %s462_s12 }
  0x13   :  { %p469_p8 = por %p468_p7, %p467_p6 }
  0x15   :  { %p470_p9 = pnand %p469_p8, %p463_p5 }
  0x17   :  { %473 = shalt.err (!%p470_p9)
}
  0x18   :  { %24 = dma.hbm_to_vmem [thread:$0]  %s595_s0, 128, %s22_s9, [#allocation4]  }
  0x19   :  { %s482_s15 = scalar_lea.vmem %s43_s11, 1024  ;;  %p487_p11 = scmp.lt.s32.totalorder %s43_s11, %s43_s11 }
  0x1a   :  { %p483_p10 = scmp.ne.s32.totalorder %s43_s11, %s482_s15  ;;  %p488_p12 = scmp.lt.s32.totalorder %s482_s15, %s482_s15 }
  0x1c   :  { %p489_p13 = por %p488_p12, %p487_p11 }
  0x1e   :  { %p490_p0 = pnand %p489_p13, %p483_p10 }
  0x20   :  { %493 = shalt.err (!%p490_p0)
}
  0x21   :  { %48 = dma.hbm_to_vmem [thread:$0]  %s597_s2, 1024, %s43_s11, [#allocation7], %s521_s27, %s521_s27, %s522_s28  }
  0x22   :  { %514 = dma.done.wait [#allocation4], 128  }
  0x23   :  { %515 = vsyncadd [#allocation4], 4294967168 }
  0x24   :  { %516 = dma.done.wait [#allocation7], 2048  }
  0x25   :  { %517 = vsyncadd [#allocation7], 4294965248  ;;  %v525_v0 = vmov 0.0   ;;  %vm526_vm0 = vmmov 0   ;;  %v418_v1 = vld [vmem:[#allocation8 + $0x38] sm:$0xff]   ;;  %v420_v3 = vld [vmem:[#allocation8 + $0x30] sm:$0xff]   ;;  %v77_v22 = vlaneseq }
  0x26   :  { %370 = vmatprep.subr.bf16.mxu0 %v525_v0  ;;  %390 = vmatprep.subr.bf16.mxu1 %v525_v0  ;;  %v419_v2 = vld [vmem:[#allocation6 + $0x38] sm:$0xff]   ;;  %v421_v4 = vld [vmem:[#allocation6 + $0x30] sm:$0xff]   ;;  %v422_v5 = vld [vmem:[#allocation8 + $0x28] sm:$0xff]  }
  0x27   :  { %386 = vmatprep.mubr.msk.bf16.mxu0 %vm526_vm0, %v525_v0  ;;  %406 = vmatprep.mubr.msk.bf16.mxu1 %vm526_vm0, %v525_v0  ;;  %v423_v6 = vld [vmem:[#allocation6 + $0x28] sm:$0xff]   ;;  %v424_v7 = vld [vmem:[#allocation8 + $0x20] sm:$0xff]   ;;  %v426_v9 = vld [vmem:[#allocation8 + $0x18] sm:$0xff]   ;;  %v78_v26 = vshrl.u32 %v77_v22, 7 }
  0x28   :  { %371 = vmatpush3.bf16.xpose.msra.mxu0 %v418_v1  ;;  %391 = vmatpush3.bf16.xpose.msra.mxu1 %v419_v2  ;;  %v425_v8 = vld [vmem:[#allocation6 + $0x20] sm:$0xff]   ;;  %v427_v10 = vld [vmem:[#allocation6 + $0x18] sm:$0xff]   ;;  %v428_v11 = vld [vmem:[#allocation8 + $0x10] sm:$0xff]  }
  0x29   :  { %372 = vmatprep.subr.bf16.mxu0 %v525_v0  ;;  %392 = vmatprep.subr.bf16.mxu1 %v525_v0  ;;  %v429_v12 = vld [vmem:[#allocation6 + $0x10] sm:$0xff]   ;;  %v430_v13 = vld [vmem:[#allocation8 + $0x8] sm:$0xff]   ;;  %v432_v15 = vld [vmem:[#allocation8] sm:$0xff]   ;;  %v79_v29 = vsub.s32 0, %v78_v26 }
  0x2a   :  { %v431_v14 = vld [vmem:[#allocation6 + $0x8] sm:$0xff]   ;;  %v83_v16 = vld [vmem:[#allocation3] sm:$0xff]  ;;  %v433_v18 = vld [vmem:[#allocation6] sm:$0xff]  }
  0x2b   :  { %v334_v17 = vld [vmem:[%s600_s5] ss:$0 sm:$0xff]  ;;  %v84_v21 = vpack.c.bf16 %v83_v16, %v83_v16 }
  0x2c   :  { %v92_v19 = vmul.f32 %v334_v17, %v83_v16  ;;  %v72_v23 = vld [vmem:[%s599_s4] sm:$0x1]  ;;  %s527_s4 = smov [#allocation9]  }
  0x2d   :  { %v73_v24 = vld [vmem:[%s601_s6] sm:$0x1]  ;;  %s324_s24 = sshll.u32 %s527_s4, 4  ;;  %s325_s24 = int_to_ptr.vmem [resolvable:$true] %s324_s24 }
  0x2e   :  { %v93_v20 = vpack.c.bf16 %v92_v19, %v92_v19  ;;  %v74_v25 = vmul.f32 %v73_v24, %v72_v23  ;;  %v71_v27 = vld [vmem:[%s598_s3] sm:$0x1]  ;;  %s494_s3 = scalar_lea.vmem %s325_s24, 128  ;;  %p499_p2 = scmp.lt.s32.totalorder %s325_s24, %s325_s24 }
  0x2f   :  { %v343_v30 = vld [vmem:[%s601_s6] ss:$0 sm:$0xff]  ;;  %p495_p1 = scmp.ne.s32.totalorder %s325_s24, %s494_s3  ;;  %p500_p3 = scmp.lt.s32.totalorder %s494_s3, %s494_s3 }
  0x30   :  { %373 = vmatpush3.bf16.xpose.msra.mxu0 %v420_v3  ;;  %393 = vmatpush3.bf16.xpose.msra.mxu1 %v421_v4  ;;  %v75_v28 = vadd.f32 %v74_v25, %v71_v27 }
  0x31   :  { %374 = vmatprep.subr.bf16.mxu0 %v525_v0  ;;  %394 = vmatprep.subr.bf16.mxu1 %v525_v0  ;;  %p501_p4 = por %p500_p3, %p499_p2 }
  0x32   :  { %v80_v33 = vrot.slane %v75_v28, %v79_v29 }
  0x33   :  { %p502_p5 = pnand %p501_p4, %p495_p1 }
  0x38   :  { %375 = vmatpush3.bf16.xpose.msra.mxu0 %v422_v5  ;;  %395 = vmatpush3.bf16.xpose.msra.mxu1 %v423_v6 }
  0x39   :  { %376 = vmatprep.subr.bf16.mxu0 %v525_v0  ;;  %396 = vmatprep.subr.bf16.mxu1 %v525_v0 }
  0x40   :  { %377 = vmatpush3.bf16.xpose.msra.mxu0 %v424_v7  ;;  %397 = vmatpush3.bf16.xpose.msra.mxu1 %v425_v8 }
  0x41   :  { %378 = vmatprep.subr.bf16.mxu0 %v525_v0  ;;  %398 = vmatprep.subr.bf16.mxu1 %v525_v0 }
  0x48   :  { %379 = vmatpush3.bf16.xpose.msra.mxu0 %v426_v9  ;;  %399 = vmatpush3.bf16.xpose.msra.mxu1 %v427_v10 }
  0x49   :  { %380 = vmatprep.subr.bf16.mxu0 %v525_v0  ;;  %400 = vmatprep.subr.bf16.mxu1 %v525_v0 }
  0x50   :  { %381 = vmatpush3.bf16.xpose.msra.mxu0 %v428_v11  ;;  %401 = vmatpush3.bf16.xpose.msra.mxu1 %v429_v12 }
  0x51   :  { %382 = vmatprep.subr.bf16.mxu0 %v525_v0  ;;  %402 = vmatprep.subr.bf16.mxu1 %v525_v0 }
  0x58   :  { %383 = vmatpush3.bf16.xpose.msra.mxu0 %v430_v13  ;;  %403 = vmatpush3.bf16.xpose.msra.mxu1 %v431_v14 }
  0x59   :  { %384 = vmatprep.subr.bf16.mxu0 %v525_v0  ;;  %404 = vmatprep.subr.bf16.mxu1 %v525_v0 }
  0x60   :  { %385 = vmatpush3.bf16.xpose.msra.mxu0 %v432_v15  ;;  %405 = vmatpush3.bf16.xpose.msra.mxu1 %v433_v18 }
  0x67   :  { %387 = vmatmul.mubr.bf16.vlgmr.msra.gmra.mxu0 %v93_v20  ;;  %407 = vmatmul.mubr.bf16.vlgmr.msra.gmra.mxu1 %v84_v21 }
 0x127   :  { %v208_v31 = vpop.f32.mrf.mxu0  ;;  %v305_v34 = vpop.f32.mrf.mxu1 }
 0x128   :  { %v222_v32 = vmul.f32 %v343_v30, %v208_v31 }
 0x129   :  { %v388_v35 = vpop.f32.mrf.mxu0  ;;  %v408_v37 = vpop.f32.mrf.mxu1 }
 0x12a   :  { %v306_v36 = vadd.f32 %v305_v34, %v222_v32 }
 0x12b   :  { %v211_v38 = vpop.f32.mrf.mxu0  ;;  %v308_v40 = vpop.f32.mrf.mxu1 }
 0x12c   :  { %v311_v39 = vadd.f32 %v306_v36, %v80_v33 }
 0x12d   :  { %v389_v41 = vpop.f32.mrf.mxu0  ;;  %v409_v42 = vpop.f32.mrf.mxu1 }
 0x12e   :  { %317 = vst [vmem:[#allocation9] sm:$0xff] %v311_v39 }
 0x12f   :  { %505 = shalt.err (!%p502_p5)
}
 0x130   :  { %327 = dma.vmem_to_hbm [thread:$0]  %s325_s24, 128, %s602_s7, [#allocation5]  }
 0x131   :  { %518 = dma.done.wait [#allocation5], 128  }
 0x132   :  { %519 = vsyncadd [#allocation5], 4294967168 }
 0x133   :  { %331 = vsyncpa [#allocation4], 1 }
 0x134   :  { %332 = vsyncpa [#allocation7], 1 }
 0x135   :  { %333 = vsyncpa [#allocation5], 1 }

</bundles_post_ra>
